<compile_context>
chip_gen: v6e
topology: v6e:2x2x1
jax: 0.10.0
libtpu: 0.0.40
codegen_flags: <defaults>
</compile_context>

<pallas_src>
import jax
import jax.numpy as jnp
from jax.experimental import pallas as pl
from jax.experimental.pallas import tpu as pltpu


_LANES = 128
_SUBLANES = 8
# Per-operand block byte budget.  Two operands (in + out), each double-buffered
# by the Pallas pipeline, gives a peak of ~4x this = 16 MiB of VMEM.
_MAX_TILE_BYTES = 4 * 1024 * 1024


def _relu_kernel(x_ref, y_ref):
    # Pure VPU elementwise op on the whole resident tile.
    y_ref[...] = jnp.maximum(x_ref[...], 0)


def _choose_row_tile(rows, lane_width, itemsize):
    max_rows = max(1, _MAX_TILE_BYTES // (lane_width * itemsize))
    if rows <= max_rows:
        return rows  # one block covers the full row extent (full-dim block is always legal)
    return max(_SUBLANES, (max_rows // _SUBLANES) * _SUBLANES)  # sublane-aligned tile


def graph_relu_features(features):
    """ReLU over the graph feature tensor via a row-tiled Pallas kernel."""
    orig_shape = features.shape
    n_elem = features.size

    # Present a lane-dense 2D slab to the kernel when possible (last dim = 128),
    # otherwise fall back to (leading, rest) with a full last dim.
    if n_elem % _LANES == 0:
        rows, lane_width = n_elem // _LANES, _LANES
    else:
        rows = orig_shape[0] if features.ndim >= 2 else 1
        lane_width = n_elem // rows
    x2d = features.reshape(rows, lane_width)

    tm = _choose_row_tile(rows, lane_width, x2d.dtype.itemsize)
    grid = (pl.cdiv(rows, tm),)

    y2d = pl.pallas_call(
        _relu_kernel,
        out_shape=jax.ShapeDtypeStruct((rows, lane_width), x2d.dtype),
        grid_spec=pltpu.PrefetchScalarGridSpec(
            num_scalar_prefetch=0,
            grid=grid,
            in_specs=[pl.BlockSpec((tm, lane_width), lambda i: (i, 0))],
            out_specs=pl.BlockSpec((tm, lane_width), lambda i: (i, 0)),
        ),
        compiler_params=pltpu.CompilerParams(
            # Independent row tiles: shard across TensorCores on v7x.
            dimension_semantics=("parallel",),
        ),
    )(x2d)

    return y2d.reshape(orig_shape)


class Graph:
    """Minimal Python-side Graph container (name / adjacency / c passthrough)."""

    def __init__(self, features, adjacency=None, c_matrices=None, name="graph"):
        self._features = features
        self.adjacency = adjacency
        self.c_matrices = c_matrices
        self.name = name

    def get_features(self):
        return self._features

    def set_features(self, features):
        self._features = features


class GraphReLU:
    """Pallas-backed equivalent of the PyTorch GraphReLU module."""

    def __call__(self, graph: Graph) -> Graph:
        # TODO(synk): the Graph wrapper is plain Python bookkeeping (name /
        # adjacency / c passthrough); only the feature ReLU is kernel compute.
        graph.set_features(graph_relu_features(graph.get_features()))
        return graph


if __name__ == "__main__":
    # Small synthetic graph consistent with the model: N entities, hidden=32.
    N, F_HID, R = 16, 32, 3

    key = jax.random.PRNGKey(0)
    k_x, k_a, k_c = jax.random.split(key, 3)

    features = jax.random.normal(k_x, (N, F_HID), dtype=jnp.float32)
    adjacency = (jax.random.uniform(k_a, (R, N, N)) < 0.3).astype(jnp.float32)
    c_matrices = jax.random.uniform(k_c, (R, N, 1), dtype=jnp.float32) + 0.5

    graph = Graph(features, adjacency, c_matrices)
    out_graph = GraphReLU()(graph)
    y = jax.block_until_ready(out_graph.get_features())

    # Plain-JAX reference of the same math.
    ref = jnp.maximum(features, 0.0)

    assert y.shape == (N, F_HID)
    assert y.dtype == features.dtype
    assert jnp.array_equal(y, ref), "mismatch vs reference ReLU"
    # Graph bookkeeping passes through untouched.
    assert out_graph.adjacency is adjacency and out_graph.c_matrices is c_matrices

    print("KERNEL_OK")
</pallas_src>

<mosaic_0001>
module attributes {stable_mosaic.version = 11 : i64} {
  func.func @_relu_kernel(%arg0: i32, %arg1: memref<4x128xf32, #tpu.memory_space<vmem>>, %arg2: memref<4x128xf32, #tpu.memory_space<vmem>>) attributes {dimension_semantics = [#tpu.dimension_semantics<parallel>], iteration_bounds = array<i64: 1>, scalar_prefetch = 0 : i64, scratch_operands = 0 : i64, tpu.core_type = #tpu.core_type<tc>, window_params = [{transform_indices = @transform_0, window_bounds = array<i64: 4, 128>}, {transform_indices = @transform_1, window_bounds = array<i64: 4, 128>}]} {
    %c0 = arith.constant 0 : index
    %c0_0 = arith.constant 0 : index
    %0 = vector.load %arg1[%c0, %c0_0] : memref<4x128xf32, #tpu.memory_space<vmem>>, vector<4x128xf32>
    %cst = arith.constant 0.000000e+00 : f32
    %1 = vector.broadcast %cst : f32 to vector<4x128xf32>
    %2 = arith.maximumf %0, %1 : vector<4x128xf32>
    %c0_1 = arith.constant 0 : index
    %c0_2 = arith.constant 0 : index
    %3 = vector.load %arg2[%c0_1, %c0_2] : memref<4x128xf32, #tpu.memory_space<vmem>>, vector<4x128xf32>
    tpu.vector_store %arg2[%c0_1, %c0_2], %2 {strides = array<i32>} : memref<4x128xf32, #tpu.memory_space<vmem>>, vector<4x128xf32>,
    return
  }
  func.func @transform_0(%arg0: i32) -> (i32, i32) {
    %c0_i32 = arith.constant 0 : i32
    %c0_i32_0 = arith.constant 0 : i32
    return %arg0, %c0_i32 : i32, i32
  }
  func.func @transform_1(%arg0: i32) -> (i32, i32) {
    %c0_i32 = arith.constant 0 : i32
    %c0_i32_0 = arith.constant 0 : i32
    return %arg0, %c0_i32 : i32, i32
  }
}

</mosaic_0001>

<bundles_post_ra>
// kernel: tpu_custom_call.1
= control target key start
LH: loop header
LB: loop body
LE: loop exit
PB: predicated region body
PF: predicated region fallthrough
CT: control target
= control target key end

     0   :  { %6 = vsyncpa [#allocation3], 0  ;;  %s103_s0 = inlined_call_operand.hbm [shape: f32[4,128], index: 0, kind: input, shape index: {}]   ;;  %s104_s1 = inlined_call_operand.hbm [shape: f32[4,128], index: 1, kind: output, shape index: {}]  }
   0x1   :  { %7 = vsyncpa [#allocation4], 0  ;;  %s85_s6 = smov [#allocation2]  }
   0x2   :  { %s14_s7 = sshll.u32 %s85_s6, 4  ;;  %s15_s7 = int_to_ptr.vmem [resolvable:$true] %s14_s7 }
   0x3   :  { %s49_s8 = scalar_lea.vmem %s15_s7, 64  ;;  %p54_p1 = scmp.lt.s32.totalorder %s15_s7, %s15_s7 }
   0x4   :  { %p50_p0 = scmp.ne.s32.totalorder %s15_s7, %s49_s8  ;;  %p55_p2 = scmp.lt.s32.totalorder %s49_s8, %s49_s8 }
   0x6   :  { %p56_p3 = por %p55_p2, %p54_p1 }
   0x8   :  { %p57_p4 = pnand %p56_p3, %p50_p0 }
   0xa   :  { %60 = shalt.err (!%p57_p4)
}
   0xb   :  { %17 = dma.hbm_to_vmem [thread:$0]  %s103_s0, 64, %s15_s7, [#allocation3]  }
   0xc   :  { %81 = dma.done.wait [#allocation3], 64  }
   0xd   :  { %82 = vsyncadd [#allocation3], 4294967232  ;;  %s86_s11 = smov [#allocation5]   ;;  %v21_v0 = vld [vmem:[#allocation2] sm:$0xf] }
   0xe   :  { %s30_s12 = sshll.u32 %s86_s11, 4  ;;  %v22_v1 = vmax.f32 %v21_v0, 0.0  ;;  %s31_s12 = int_to_ptr.vmem [resolvable:$true] %s30_s12 }
   0xf   :  { %s61_s13 = scalar_lea.vmem %s31_s12, 64  ;;  %p66_p6 = scmp.lt.s32.totalorder %s31_s12, %s31_s12 }
  0x10   :  { %23 = vst [vmem:[#allocation5] sm:$0xf] %v22_v1  ;;  %p62_p5 = scmp.ne.s32.totalorder %s31_s12, %s61_s13  ;;  %p67_p7 = scmp.lt.s32.totalorder %s61_s13, %s61_s13 }
  0x12   :  { %p68_p8 = por %p67_p7, %p66_p6 }
  0x14   :  { %p69_p9 = pnand %p68_p8, %p62_p5 }
  0x16   :  { %72 = shalt.err (!%p69_p9)
}
  0x17   :  { %33 = dma.vmem_to_hbm [thread:$0]  %s31_s12, 64, %s104_s1, [#allocation4]  }
  0x18   :  { %83 = dma.done.wait [#allocation4], 64  }
  0x19   :  { %84 = vsyncadd [#allocation4], 4294967232 }
  0x1a   :  { %37 = vsyncpa [#allocation3], 1 }
  0x1b   :  { %38 = vsyncpa [#allocation4], 1 }

</bundles_post_ra>
